<compile_context>
chip_gen: v7x
topology: tpu7x:2x2x1
jax: 0.10.0
libtpu: 0.0.40
codegen_flags: <defaults>
</compile_context>

<pallas_src>
import functools

import jax
import jax.numpy as jnp
import numpy as np
from jax.experimental import pallas as pl
from jax.experimental.pallas import tpu as pltpu


def head_kernel(x_ref, w1_ref, b1_ref, w2_ref, b2_ref, w3_ref, b3_ref, out_ref, *, Wp):
    """One (image, row-tile) per grid step.

    x_ref  : (Cin, Lt) bf16     haloed row-tile; channels on sublanes, flat
                                padded spatial (f = local_row*Wp + col over the
                                (TR+2, Wp) window) on lanes, zero tail up to Lt.
    w1_ref : (3, 3, C4p, Cin)   bf16 conv1 weights, BN1 folded, C4 padded to C4p.
    b1_ref : (C4p, 1) f32       folded BN1 bias.
    w2_ref : (4*C4p, C4p) bf16  convT2 weights, BN2 folded, 4 taps stacked on rows.
    b2_ref : (4*C4p, 1) f32     folded convT2+BN2 bias, tiled per tap.
    w3_ref : (4, C4p) bf16      convT3 weights; row e = ey*2+ex (same for every tap).
    b3_ref : (1, 1) f32         convT3 bias.
    out_ref: (16, Lt) f32       row r = (dy*2+dx)*4 + (ey*2+ex) holds the sigmoid
                                map of output pixel (4h + 2*dy+ey, 4w + 2*dx+ex)
                                at lane f = (local_row)*Wp + col.
    """
    x = x_ref[...]                                   # (Cin, Lt) bf16, loaded once
    L = x.shape[1]
    C4p = w1_ref.shape[2]

    # ---- conv1 (3x3, pad=1) + BN1 + ReLU -----------------------------------
    # Per tap: matmul first, then roll the small (C4p, Lt) RESULT on the lane
    # axis (roll commutes with the per-lane linear map).  Interior lanes never
    # read wrapped data because the tile carries a one-padded-row halo.
    acc = jnp.zeros((C4p, L), dtype=jnp.float32)
    for dy in range(3):
        for dx in range(3):
            s = (dy - 1) * Wp + (dx - 1)             # want acc[f] += r[f + s]
            r = jnp.dot(w1_ref[dy, dx], x, preferred_element_type=jnp.float32)
            acc = acc + (r if s == 0 else pltpu.roll(r, (-s) % L, 1))
    x1 = jnp.maximum(acc + b1_ref[...], 0.0).astype(jnp.bfloat16)   # (C4p, Lt)

    # ---- convT2 (2x2, stride 2) + BN2 + ReLU: one fused matmul over 4 taps --
    z = jnp.dot(w2_ref[...], x1, preferred_element_type=jnp.float32) + b2_ref[...]
    z = jnp.maximum(z, 0.0).astype(jnp.bfloat16)     # (4*C4p, Lt)

    # ---- convT3 (2x2, stride 2) + sigmoid: 4 dense (4,C4p)x(C4p,Lt) matmuls --
    w3 = w3_ref[...]                                 # (4, C4p) bf16
    outs = []
    for k in range(4):                               # tap k = dy*2 + dx
        zk = z[k * C4p:(k + 1) * C4p, :]
        outs.append(jnp.dot(w3, zk, preferred_element_type=jnp.float32))
    o = jnp.concatenate(outs, axis=0) + b3_ref[...]  # (16, Lt)
    out_ref[...] = jax.nn.sigmoid(o)                 # single lane-dense store


def _pick_tile_rows(H, max_rows=32):
    """Largest divisor of H that is <= max_rows (keeps tiles VMEM-friendly)."""
    for tr in range(min(H, max_rows), 0, -1):
        if H % tr == 0:
            return tr
    return H


def head_forward(x_nchw, packed, tile_rows=None):
    """Forward of Head. x_nchw: (N, Cin, H, W) float32 -> (N, 1, 4H, 4W) float32."""
    w1t, b1, w2cat, b2cat, w3s, b3 = packed
    N, Cin, H, W = x_nchw.shape
    Hp, Wp = H + 2, W + 2
    C4p = w1t.shape[2]

    TR = _pick_tile_rows(H) if tile_rows is None else tile_rows
    assert H % TR == 0, "tile_rows must divide H"
    n_tiles = H // TR
    Lt = pl.cdiv((TR + 2) * Wp, 128) * 128           # lane-dense flat tile length

    # bf16 before padding halves the wrapper copy traffic of the dominant tensor.
    xb = x_nchw.astype(jnp.bfloat16)
    xp = jnp.pad(xb, ((0, 0), (0, 0), (1, 1), (1, 1)))            # (N,Cin,Hp,Wp)
    # Haloed row windows: tile t covers padded rows [t*TR, t*TR + TR + 2).
    row_idx = jnp.arange(n_tiles)[:, None] * TR + jnp.arange(TR + 2)[None, :]
    xt = xp[:, :, row_idx, :]                                     # (N,Cin,nt,TR+2,Wp)
    xt = xt.transpose(0, 2, 1, 3, 4).reshape(N, n_tiles, Cin, (TR + 2) * Wp)
    xt = jnp.pad(xt, ((0, 0), (0, 0), (0, 0), (0, Lt - (TR + 2) * Wp)))

    # NOTE: for very small images in a real serving path, pack several images
    # into one grid step (stack along lanes) so the lane extent is >= 512.
    out_blk = pl.pallas_call(
        functools.partial(head_kernel, Wp=Wp),
        out_shape=jax.ShapeDtypeStruct((N, n_tiles, 16, Lt), jnp.float32),
        grid_spec=pltpu.PrefetchScalarGridSpec(
            num_scalar_prefetch=0,
            grid=(N, n_tiles),
            in_specs=[
                pl.BlockSpec((pl.Squeezed(), pl.Squeezed(), Cin, Lt),
                             lambda n, t: (n, t, 0, 0)),
                pl.BlockSpec((3, 3, C4p, Cin), lambda n, t: (0, 0, 0, 0)),
                pl.BlockSpec((C4p, 1), lambda n, t: (0, 0)),
                pl.BlockSpec((4 * C4p, C4p), lambda n, t: (0, 0)),
                pl.BlockSpec((4 * C4p, 1), lambda n, t: (0, 0)),
                pl.BlockSpec((4, C4p), lambda n, t: (0, 0)),
                pl.BlockSpec((1, 1), lambda n, t: (0, 0)),
            ],
            out_specs=pl.BlockSpec((pl.Squeezed(), pl.Squeezed(), 16, Lt),
                                   lambda n, t: (n, t, 0, 0)),
        ),
        compiler_params=pltpu.CompilerParams(
            # batch and row-tiles are independent -> both cores stay busy even
            # for N == 1 (v7x has 2 TensorCores per chip).
            dimension_semantics=("parallel", "parallel")),
    )(xt, w1t, b1, w2cat, b2cat, w3s, b3)

    # De-interleave: row r = (dy,dx,ey,ex); lane = local_row*Wp + col within the
    # tile window.  Interior: local rows 1..TR, cols 1..W.
    o = out_blk[:, :, :, :(TR + 2) * Wp].reshape(N, n_tiles, 2, 2, 2, 2, TR + 2, Wp)
    o = o[:, :, :, :, :, :, 1:1 + TR, 1:1 + W]       # (N,nt,dy,dx,ey,ex,TR,W)
    y = o.transpose(0, 1, 6, 2, 4, 7, 3, 5).reshape(N, 4 * H, 4 * W)
    return y[:, None, :, :]                          # (N, 1, 4H, 4W)


def init_raw_params(key, in_channels):
    """Deterministic synthetic parameters in PyTorch layout (+ BN running stats)."""
    C, C4 = in_channels, in_channels // 4
    ks = jax.random.split(key, 13)
    w1 = 0.1 * jax.random.normal(ks[0], (C4, C, 3, 3), jnp.float32)   # Conv2d
    g1 = 1.0 + 0.1 * jax.random.normal(ks[1], (C4,), jnp.float32)
    beta1 = 0.1 * jax.random.normal(ks[2], (C4,), jnp.float32)
    m1 = 0.1 * jax.random.normal(ks[3], (C4,), jnp.float32)
    v1 = jax.random.uniform(ks[4], (C4,), jnp.float32, 0.5, 1.5)
    w2 = 0.1 * jax.random.normal(ks[5], (C4, C4, 2, 2), jnp.float32)  # ConvT2d
    b2 = 0.1 * jax.random.normal(ks[6], (C4,), jnp.float32)
    g2 = 1.0 + 0.1 * jax.random.normal(ks[7], (C4,), jnp.float32)
    beta2 = 0.1 * jax.random.normal(ks[8], (C4,), jnp.float32)
    m2 = 0.1 * jax.random.normal(ks[9], (C4,), jnp.float32)
    v2 = jax.random.uniform(ks[10], (C4,), jnp.float32, 0.5, 1.5)
    w3 = 0.1 * jax.random.normal(ks[11], (C4, 1, 2, 2), jnp.float32)  # ConvT2d
    b3 = 0.1 * jax.random.normal(ks[12], (1,), jnp.float32)
    return (w1, g1, beta1, m1, v1, w2, b2, g2, beta2, m2, v2, w3, b3)


def pack_params(raw, eps=1e-5):
    """Fold eval-mode BN into the convs and pack into the kernel's fused layout."""
    (w1, g1, beta1, m1, v1, w2, b2, g2, beta2, m2, v2, w3, b3) = raw
    C4, C = w1.shape[0], w1.shape[1]
    C4p = ((C4 + 7) // 8) * 8               # pad channel dim to a sublane multiple

    s1 = g1 / jnp.sqrt(v1 + eps)
    w1k = jnp.transpose(w1, (2, 3, 0, 1)) * s1[None, None, :, None]    # (3,3,C4,C)
    w1t = jnp.zeros((3, 3, C4p, C), jnp.float32).at[:, :, :C4, :].set(w1k)
    b1 = jnp.zeros((C4p, 1), jnp.float32).at[:C4, 0].set(beta1 - m1 * s1)

    s2 = g2 / jnp.sqrt(v2 + eps)
    w2k = jnp.transpose(w2 * s2[None, :, None, None], (2, 3, 1, 0))    # (ky,kx,co,ci)
    b2f = (b2 - m2) * s2 + beta2
    w2cat = jnp.zeros((4 * C4p, C4p), jnp.float32)
    b2cat = jnp.zeros((4 * C4p, 1), jnp.float32)
    for ky in range(2):
        for kx in range(2):
            k = ky * 2 + kx
            w2cat = w2cat.at[k * C4p:k * C4p + C4, :C4].set(w2k[ky, kx])
            b2cat = b2cat.at[k * C4p:k * C4p + C4, 0].set(b2f)

    # convT3: output sub-pixel (ey,ex) within any tap uses the same (C4,) weight
    # w3[:,0,ey,ex] -> a single dense (4, C4p) matrix shared by all 4 taps.
    w3s = jnp.zeros((4, C4p), jnp.float32)
    for ey in range(2):
        for ex in range(2):
            w3s = w3s.at[ey * 2 + ex, :C4].set(w3[:, 0, ey, ex])
    b3k = b3.reshape(1, 1)

    return (w1t.astype(jnp.bfloat16), b1,
            w2cat.astype(jnp.bfloat16), b2cat,
            w3s.astype(jnp.bfloat16), b3k)


def ref_forward(x, raw, eps=1e-5):
    """Pure-JAX f32 reference using the RAW (unfolded) params, eval-mode BN."""
    (w1, g1, beta1, m1, v1, w2, b2, g2, beta2, m2, v2, w3, b3) = raw
    N, C, H, W = x.shape
    C4 = w1.shape[0]
    xp = jnp.pad(x, ((0, 0), (0, 0), (1, 1), (1, 1)))
    y1 = jnp.zeros((N, C4, H, W), jnp.float32)
    for dy in range(3):
        for dx in range(3):
            y1 = y1 + jnp.einsum('ncij,dc->ndij',
                                 xp[:, :, dy:dy + H, dx:dx + W], w1[:, :, dy, dx])
    y1 = (y1 - m1[None, :, None, None]) / jnp.sqrt(v1[None, :, None, None] + eps) \
        * g1[None, :, None, None] + beta1[None, :, None, None]
    y1 = jnp.maximum(y1, 0.0)
    y2 = jnp.zeros((N, C4, 2 * H, 2 * W), jnp.float32)
    for ky in range(2):
        for kx in range(2):
            z = jnp.einsum('ncij,cd->ndij', y1, w2[:, :, ky, kx]) + b2[None, :, None, None]
            y2 = y2.at[:, :, ky::2, kx::2].set(z)
    y2 = (y2 - m2[None, :, None, None]) / jnp.sqrt(v2[None, :, None, None] + eps) \
        * g2[None, :, None, None] + beta2[None, :, None, None]
    y2 = jnp.maximum(y2, 0.0)
    y3 = jnp.zeros((N, 1, 4 * H, 4 * W), jnp.float32)
    for ey in range(2):
        for ex in range(2):
            z = jnp.einsum('ncij,c->nij', y2, w3[:, 0, ey, ex])[:, None] \
                + b3[None, :, None, None]
            y3 = y3.at[:, :, ey::2, ex::2].set(z)
    return jax.nn.sigmoid(y3)


if __name__ == "__main__":
    key = jax.random.PRNGKey(0)
    kx, kp = jax.random.split(key)

    N, C, H, W = 2, 16, 16, 16            # in_channels=16 -> C//4 = 4
    x = jax.random.normal(kx, (N, C, H, W), jnp.float32)
    raw = init_raw_params(kp, C)
    packed = pack_params(raw)

    # tile_rows=8 -> 2 row tiles per image, exercising the haloed tiling path.
    out = jax.block_until_ready(head_forward(x, packed, tile_rows=8))
    assert out.shape == (N, 1, 4 * H, 4 * W), out.shape

    ref = jax.block_until_ready(ref_forward(x, raw))
    # bf16 matmul operands (f32 accumulation): post-sigmoid tolerance loosened.
    np.testing.assert_allclose(np.asarray(out), np.asarray(ref), rtol=2e-2, atol=2e-2)

    print("KERNEL_OK")
</pallas_src>

<mosaic_0001>
module attributes {stable_mosaic.version = 11 : i64} {
  func.func @head_kernel(%arg0: i32, %arg1: i32, %arg2: memref<1x1x16x256xbf16, #tpu.memory_space<vmem>>, %arg3: memref<3x3x8x16xbf16, #tpu.memory_space<vmem>>, %arg4: memref<8x1xf32, #tpu.memory_space<vmem>>, %arg5: memref<32x8xbf16, #tpu.memory_space<vmem>>, %arg6: memref<32x1xf32, #tpu.memory_space<vmem>>, %arg7: memref<4x8xbf16, #tpu.memory_space<vmem>>, %arg8: memref<1x1xf32, #tpu.memory_space<vmem>>, %arg9: memref<1x1x16x256xf32, #tpu.memory_space<vmem>>) attributes {dimension_semantics = [#tpu.dimension_semantics<parallel>, #tpu.dimension_semantics<parallel>], iteration_bounds = array<i64: 2, 2>, scalar_prefetch = 0 : i64, scratch_operands = 0 : i64, tpu.core_type = #tpu.core_type<tc>, window_params = [{transform_indices = @transform_0, window_bounds = array<i64: 1, 1, 16, 256>}, {pipeline_mode = #tpu.pipeline_mode<synchronous>, transform_indices = @transform_1, window_bounds = array<i64: 3, 3, 8, 16>}, {pipeline_mode = #tpu.pipeline_mode<synchronous>, transform_indices = @transform_2, window_bounds = array<i64: 8, 1>}, {pipeline_mode = #tpu.pipeline_mode<synchronous>, transform_indices = @transform_3, window_bounds = array<i64: 32, 8>}, {pipeline_mode = #tpu.pipeline_mode<synchronous>, transform_indices = @transform_4, window_bounds = array<i64: 32, 1>}, {pipeline_mode = #tpu.pipeline_mode<synchronous>, transform_indices = @transform_5, window_bounds = array<i64: 4, 8>}, {pipeline_mode = #tpu.pipeline_mode<synchronous>, transform_indices = @transform_6, window_bounds = array<i64: 1, 1>}, {transform_indices = @transform_7, window_bounds = array<i64: 1, 1, 16, 256>}]} {
    %c0 = arith.constant 0 : index
    %c0_0 = arith.constant 0 : index
    %c0_1 = arith.constant 0 : index
    %c0_2 = arith.constant 0 : index
    %0 = vector.load %arg2[%c0, %c0_0, %c0_1, %c0_2] : memref<1x1x16x256xbf16, #tpu.memory_space<vmem>>, vector<1x1x16x256xbf16>
    %1 = vector.shape_cast %0 : vector<1x1x16x256xbf16> to vector<16x256xbf16>
    %cst = arith.constant 0.000000e+00 : f32
    %2 = vector.broadcast %cst : f32 to vector<8x256xf32>
    %c0_3 = arith.constant 0 : index
    %c0_4 = arith.constant 0 : index
    %c0_5 = arith.constant 0 : index
    %c0_6 = arith.constant 0 : index
    %3 = vector.load %arg3[%c0_3, %c0_4, %c0_5, %c0_6] : memref<3x3x8x16xbf16, #tpu.memory_space<vmem>>, vector<1x1x8x16xbf16>
    %4 = vector.shape_cast %3 : vector<1x1x8x16xbf16> to vector<8x16xbf16>
    %cst_7 = arith.constant dense<0.000000e+00> : vector<8x256xf32>
    %5 = tpu.matmul %4, %1, %cst_7 {dimension_numbers = #tpu.dot_dimension_numbers<[1], [0], [0], [1], [0, 0, 1, 1], [], []>} : vector<8x16xbf16>, vector<16x256xbf16>, vector<8x256xf32> -> vector<8x256xf32>
    %c19_i32 = arith.constant 19 : i32
    %6 = tpu.dynamic_rotate %5 by %c19_i32 dim 1 : vector<8x256xf32>, i32 -> vector<8x256xf32>
    %7 = arith.addf %2, %6 : vector<8x256xf32>
    %c0_8 = arith.constant 0 : index
    %c1 = arith.constant 1 : index
    %c0_9 = arith.constant 0 : index
    %c0_10 = arith.constant 0 : index
    %8 = vector.load %arg3[%c0_8, %c1, %c0_9, %c0_10] : memref<3x3x8x16xbf16, #tpu.memory_space<vmem>>, vector<1x1x8x16xbf16>
    %9 = vector.shape_cast %8 : vector<1x1x8x16xbf16> to vector<8x16xbf16>
    %cst_11 = arith.constant dense<0.000000e+00> : vector<8x256xf32>
    %10 = tpu.matmul %9, %1, %cst_11 {dimension_numbers = #tpu.dot_dimension_numbers<[1], [0], [0], [1], [0, 0, 1, 1], [], []>} : vector<8x16xbf16>, vector<16x256xbf16>, vector<8x256xf32> -> vector<8x256xf32>
    %c18_i32 = arith.constant 18 : i32
    %11 = tpu.dynamic_rotate %10 by %c18_i32 dim 1 : vector<8x256xf32>, i32 -> vector<8x256xf32>
    %12 = arith.addf %7, %11 : vector<8x256xf32>
    %c0_12 = arith.constant 0 : index
    %c2 = arith.constant 2 : index
    %c0_13 = arith.constant 0 : index
    %c0_14 = arith.constant 0 : index
    %13 = vector.load %arg3[%c0_12, %c2, %c0_13, %c0_14] : memref<3x3x8x16xbf16, #tpu.memory_space<vmem>>, vector<1x1x8x16xbf16>
    %14 = vector.shape_cast %13 : vector<1x1x8x16xbf16> to vector<8x16xbf16>
    %cst_15 = arith.constant dense<0.000000e+00> : vector<8x256xf32>
    %15 = tpu.matmul %14, %1, %cst_15 {dimension_numbers = #tpu.dot_dimension_numbers<[1], [0], [0], [1], [0, 0, 1, 1], [], []>} : vector<8x16xbf16>, vector<16x256xbf16>, vector<8x256xf32> -> vector<8x256xf32>
    %c17_i32 = arith.constant 17 : i32
    %16 = tpu.dynamic_rotate %15 by %c17_i32 dim 1 : vector<8x256xf32>, i32 -> vector<8x256xf32>
    %17 = arith.addf %12, %16 : vector<8x256xf32>
    %c1_16 = arith.constant 1 : index
    %c0_17 = arith.constant 0 : index
    %c0_18 = arith.constant 0 : index
    %c0_19 = arith.constant 0 : index
    %18 = vector.load %arg3[%c1_16, %c0_17, %c0_18, %c0_19] : memref<3x3x8x16xbf16, #tpu.memory_space<vmem>>, vector<1x1x8x16xbf16>
    %19 = vector.shape_cast %18 : vector<1x1x8x16xbf16> to vector<8x16xbf16>
    %cst_20 = arith.constant dense<0.000000e+00> : vector<8x256xf32>
    %20 = tpu.matmul %19, %1, %cst_20 {dimension_numbers = #tpu.dot_dimension_numbers<[1], [0], [0], [1], [0, 0, 1, 1], [], []>} : vector<8x16xbf16>, vector<16x256xbf16>, vector<8x256xf32> -> vector<8x256xf32>
    %c1_i32 = arith.constant 1 : i32
    %21 = tpu.dynamic_rotate %20 by %c1_i32 dim 1 : vector<8x256xf32>, i32 -> vector<8x256xf32>
    %22 = arith.addf %17, %21 : vector<8x256xf32>
    %c1_21 = arith.constant 1 : index
    %c1_22 = arith.constant 1 : index
    %c0_23 = arith.constant 0 : index
    %c0_24 = arith.constant 0 : index
    %23 = vector.load %arg3[%c1_21, %c1_22, %c0_23, %c0_24] : memref<3x3x8x16xbf16, #tpu.memory_space<vmem>>, vector<1x1x8x16xbf16>
    %24 = vector.shape_cast %23 : vector<1x1x8x16xbf16> to vector<8x16xbf16>
    %cst_25 = arith.constant dense<0.000000e+00> : vector<8x256xf32>
    %25 = tpu.matmul %24, %1, %cst_25 {dimension_numbers = #tpu.dot_dimension_numbers<[1], [0], [0], [1], [0, 0, 1, 1], [], []>} : vector<8x16xbf16>, vector<16x256xbf16>, vector<8x256xf32> -> vector<8x256xf32>
    %26 = arith.addf %22, %25 : vector<8x256xf32>
    %c1_26 = arith.constant 1 : index
    %c2_27 = arith.constant 2 : index
    %c0_28 = arith.constant 0 : index
    %c0_29 = arith.constant 0 : index
    %27 = vector.load %arg3[%c1_26, %c2_27, %c0_28, %c0_29] : memref<3x3x8x16xbf16, #tpu.memory_space<vmem>>, vector<1x1x8x16xbf16>
    %28 = vector.shape_cast %27 : vector<1x1x8x16xbf16> to vector<8x16xbf16>
    %cst_30 = arith.constant dense<0.000000e+00> : vector<8x256xf32>
    %29 = tpu.matmul %28, %1, %cst_30 {dimension_numbers = #tpu.dot_dimension_numbers<[1], [0], [0], [1], [0, 0, 1, 1], [], []>} : vector<8x16xbf16>, vector<16x256xbf16>, vector<8x256xf32> -> vector<8x256xf32>
    %c255_i32 = arith.constant 255 : i32
    %30 = tpu.dynamic_rotate %29 by %c255_i32 dim 1 : vector<8x256xf32>, i32 -> vector<8x256xf32>
    %31 = arith.addf %26, %30 : vector<8x256xf32>
    %c2_31 = arith.constant 2 : index
    %c0_32 = arith.constant 0 : index
    %c0_33 = arith.constant 0 : index
    %c0_34 = arith.constant 0 : index
    %32 = vector.load %arg3[%c2_31, %c0_32, %c0_33, %c0_34] : memref<3x3x8x16xbf16, #tpu.memory_space<vmem>>, vector<1x1x8x16xbf16>
    %33 = vector.shape_cast %32 : vector<1x1x8x16xbf16> to vector<8x16xbf16>
    %cst_35 = arith.constant dense<0.000000e+00> : vector<8x256xf32>
    %34 = tpu.matmul %33, %1, %cst_35 {dimension_numbers = #tpu.dot_dimension_numbers<[1], [0], [0], [1], [0, 0, 1, 1], [], []>} : vector<8x16xbf16>, vector<16x256xbf16>, vector<8x256xf32> -> vector<8x256xf32>
    %c239_i32 = arith.constant 239 : i32
    %35 = tpu.dynamic_rotate %34 by %c239_i32 dim 1 : vector<8x256xf32>, i32 -> vector<8x256xf32>
    %36 = arith.addf %31, %35 : vector<8x256xf32>
    %c2_36 = arith.constant 2 : index
    %c1_37 = arith.constant 1 : index
    %c0_38 = arith.constant 0 : index
    %c0_39 = arith.constant 0 : index
    %37 = vector.load %arg3[%c2_36, %c1_37, %c0_38, %c0_39] : memref<3x3x8x16xbf16, #tpu.memory_space<vmem>>, vector<1x1x8x16xbf16>
    %38 = vector.shape_cast %37 : vector<1x1x8x16xbf16> to vector<8x16xbf16>
    %cst_40 = arith.constant dense<0.000000e+00> : vector<8x256xf32>
    %39 = tpu.matmul %38, %1, %cst_40 {dimension_numbers = #tpu.dot_dimension_numbers<[1], [0], [0], [1], [0, 0, 1, 1], [], []>} : vector<8x16xbf16>, vector<16x256xbf16>, vector<8x256xf32> -> vector<8x256xf32>
    %c238_i32 = arith.constant 238 : i32
    %40 = tpu.dynamic_rotate %39 by %c238_i32 dim 1 : vector<8x256xf32>, i32 -> vector<8x256xf32>
    %41 = arith.addf %36, %40 : vector<8x256xf32>
    %c2_41 = arith.constant 2 : index
    %c2_42 = arith.constant 2 : index
    %c0_43 = arith.constant 0 : index
    %c0_44 = arith.constant 0 : index
    %42 = vector.load %arg3[%c2_41, %c2_42, %c0_43, %c0_44] : memref<3x3x8x16xbf16, #tpu.memory_space<vmem>>, vector<1x1x8x16xbf16>
    %43 = vector.shape_cast %42 : vector<1x1x8x16xbf16> to vector<8x16xbf16>
    %cst_45 = arith.constant dense<0.000000e+00> : vector<8x256xf32>
    %44 = tpu.matmul %43, %1, %cst_45 {dimension_numbers = #tpu.dot_dimension_numbers<[1], [0], [0], [1], [0, 0, 1, 1], [], []>} : vector<8x16xbf16>, vector<16x256xbf16>, vector<8x256xf32> -> vector<8x256xf32>
    %c237_i32 = arith.constant 237 : i32
    %45 = tpu.dynamic_rotate %44 by %c237_i32 dim 1 : vector<8x256xf32>, i32 -> vector<8x256xf32>
    %46 = arith.addf %41, %45 : vector<8x256xf32>
    %c0_46 = arith.constant 0 : index
    %c0_47 = arith.constant 0 : index
    %47 = vector.load %arg4[%c0_46, %c0_47] : memref<8x1xf32, #tpu.memory_space<vmem>>, vector<8x1xf32>
    %48 = vector.broadcast %47 : vector<8x1xf32> to vector<8x256xf32>
    %49 = arith.addf %46, %48 : vector<8x256xf32>
    %cst_48 = arith.constant 0.000000e+00 : f32
    %50 = vector.broadcast %cst_48 : f32 to vector<8x256xf32>
    %51 = arith.maximumf %49, %50 : vector<8x256xf32>
    %52 = arith.truncf %51 : vector<8x256xf32> to vector<8x256xbf16>
    %c0_49 = arith.constant 0 : index
    %c0_50 = arith.constant 0 : index
    %53 = vector.load %arg5[%c0_49, %c0_50] : memref<32x8xbf16, #tpu.memory_space<vmem>>, vector<32x8xbf16>
    %cst_51 = arith.constant dense<0.000000e+00> : vector<32x256xf32>
    %54 = tpu.matmul %53, %52, %cst_51 {dimension_numbers = #tpu.dot_dimension_numbers<[1], [0], [0], [1], [0, 0, 1, 1], [], []>} : vector<32x8xbf16>, vector<8x256xbf16>, vector<32x256xf32> -> vector<32x256xf32>
    %c0_52 = arith.constant 0 : index
    %c0_53 = arith.constant 0 : index
    %55 = vector.load %arg6[%c0_52, %c0_53] : memref<32x1xf32, #tpu.memory_space<vmem>>, vector<32x1xf32>
    %56 = vector.broadcast %55 : vector<32x1xf32> to vector<32x256xf32>
    %57 = arith.addf %54, %56 : vector<32x256xf32>
    %cst_54 = arith.constant 0.000000e+00 : f32
    %58 = vector.broadcast %cst_54 : f32 to vector<32x256xf32>
    %59 = arith.maximumf %57, %58 : vector<32x256xf32>
    %60 = arith.truncf %59 : vector<32x256xf32> to vector<32x256xbf16>
    %c0_55 = arith.constant 0 : index
    %c0_56 = arith.constant 0 : index
    %61 = vector.load %arg7[%c0_55, %c0_56] : memref<4x8xbf16, #tpu.memory_space<vmem>>, vector<4x8xbf16>
    %62 = vector.extract_strided_slice %60 {offsets = [0, 0], sizes = [8, 256], strides = [1, 1]} : vector<32x256xbf16> to vector<8x256xbf16>
    %cst_57 = arith.constant dense<0.000000e+00> : vector<4x256xf32>
    %63 = tpu.matmul %61, %62, %cst_57 {dimension_numbers = #tpu.dot_dimension_numbers<[1], [0], [0], [1], [0, 0, 1, 1], [], []>} : vector<4x8xbf16>, vector<8x256xbf16>, vector<4x256xf32> -> vector<4x256xf32>
    %64 = vector.extract_strided_slice %60 {offsets = [8, 0], sizes = [8, 256], strides = [1, 1]} : vector<32x256xbf16> to vector<8x256xbf16>
    %cst_58 = arith.constant dense<0.000000e+00> : vector<4x256xf32>
    %65 = tpu.matmul %61, %64, %cst_58 {dimension_numbers = #tpu.dot_dimension_numbers<[1], [0], [0], [1], [0, 0, 1, 1], [], []>} : vector<4x8xbf16>, vector<8x256xbf16>, vector<4x256xf32> -> vector<4x256xf32>
    %66 = vector.extract_strided_slice %60 {offsets = [16, 0], sizes = [8, 256], strides = [1, 1]} : vector<32x256xbf16> to vector<8x256xbf16>
    %cst_59 = arith.constant dense<0.000000e+00> : vector<4x256xf32>
    %67 = tpu.matmul %61, %66, %cst_59 {dimension_numbers = #tpu.dot_dimension_numbers<[1], [0], [0], [1], [0, 0, 1, 1], [], []>} : vector<4x8xbf16>, vector<8x256xbf16>, vector<4x256xf32> -> vector<4x256xf32>
    %68 = vector.extract_strided_slice %60 {offsets = [24, 0], sizes = [8, 256], strides = [1, 1]} : vector<32x256xbf16> to vector<8x256xbf16>
    %cst_60 = arith.constant dense<0.000000e+00> : vector<4x256xf32>
    %69 = tpu.matmul %61, %68, %cst_60 {dimension_numbers = #tpu.dot_dimension_numbers<[1], [0], [0], [1], [0, 0, 1, 1], [], []>} : vector<4x8xbf16>, vector<8x256xbf16>, vector<4x256xf32> -> vector<4x256xf32>
    %70 = tpu.concatenate %63, %65, %67, %69 in 0 : vector<4x256xf32>, vector<4x256xf32>, vector<4x256xf32>, vector<4x256xf32> -> vector<16x256xf32>
    %c0_61 = arith.constant 0 : index
    %c0_62 = arith.constant 0 : index
    %71 = vector.load %arg8[%c0_61, %c0_62] : memref<1x1xf32, #tpu.memory_space<vmem>>, vector<1x1xf32>
    %72 = vector.broadcast %71 : vector<1x1xf32> to vector<16x256xf32>
    %73 = arith.addf %70, %72 : vector<16x256xf32>
    %74 = arith.negf %73 : vector<16x256xf32>
    %75 = math.exp %74 : vector<16x256xf32>
    %cst_63 = arith.constant 1.000000e+00 : f32
    %76 = vector.broadcast %cst_63 : f32 to vector<16x256xf32>
    %77 = arith.addf %76, %75 : vector<16x256xf32>
    %78 = arith.divf %76, %77 : vector<16x256xf32>
    %c0_64 = arith.constant 0 : index
    %c0_65 = arith.constant 0 : index
    %c0_66 = arith.constant 0 : index
    %c0_67 = arith.constant 0 : index
    %79 = vector.load %arg9[%c0_64, %c0_65, %c0_66, %c0_67] : memref<1x1x16x256xf32, #tpu.memory_space<vmem>>, vector<1x1x16x256xf32>
    %80 = vector.shape_cast %79 : vector<1x1x16x256xf32> to vector<16x256xf32>
    %81 = vector.shape_cast %78 : vector<16x256xf32> to vector<1x1x16x256xf32>
    tpu.vector_store %arg9[%c0_64, %c0_65, %c0_66, %c0_67], %81 {strides = array<i32>} : memref<1x1x16x256xf32, #tpu.memory_space<vmem>>, vector<1x1x16x256xf32>,
    return
  }
  func.func @transform_0(%arg0: i32, %arg1: i32) -> (i32, i32, i32, i32) {
    %c0_i32 = arith.constant 0 : i32
    %c0_i32_0 = arith.constant 0 : i32
    %c0_i32_1 = arith.constant 0 : i32
    return %arg0, %arg1, %c0_i32, %c0_i32_0 : i32, i32, i32, i32
  }
  func.func @transform_1(%arg0: i32, %arg1: i32) -> (i32, i32, i32, i32) {
    %c0_i32 = arith.constant 0 : i32
    %c0_i32_0 = arith.constant 0 : i32
    %c0_i32_1 = arith.constant 0 : i32
    %c0_i32_2 = arith.constant 0 : i32
    %c0_i32_3 = arith.constant 0 : i32
    return %c0_i32, %c0_i32_0, %c0_i32_1, %c0_i32_2 : i32, i32, i32, i32
  }
  func.func @transform_2(%arg0: i32, %arg1: i32) -> (i32, i32) {
    %c0_i32 = arith.constant 0 : i32
    %c0_i32_0 = arith.constant 0 : i32
    %c0_i32_1 = arith.constant 0 : i32
    return %c0_i32, %c0_i32_0 : i32, i32
  }
  func.func @transform_3(%arg0: i32, %arg1: i32) -> (i32, i32) {
    %c0_i32 = arith.constant 0 : i32
    %c0_i32_0 = arith.constant 0 : i32
    %c0_i32_1 = arith.constant 0 : i32
    return %c0_i32, %c0_i32_0 : i32, i32
  }
  func.func @transform_4(%arg0: i32, %arg1: i32) -> (i32, i32) {
    %c0_i32 = arith.constant 0 : i32
    %c0_i32_0 = arith.constant 0 : i32
    %c0_i32_1 = arith.constant 0 : i32
    return %c0_i32, %c0_i32_0 : i32, i32
  }
  func.func @transform_5(%arg0: i32, %arg1: i32) -> (i32, i32) {
    %c0_i32 = arith.constant 0 : i32
    %c0_i32_0 = arith.constant 0 : i32
    %c0_i32_1 = arith.constant 0 : i32
    return %c0_i32, %c0_i32_0 : i32, i32
  }
  func.func @transform_6(%arg0: i32, %arg1: i32) -> (i32, i32) {
    %c0_i32 = arith.constant 0 : i32
    %c0_i32_0 = arith.constant 0 : i32
    %c0_i32_1 = arith.constant 0 : i32
    return %c0_i32, %c0_i32_0 : i32, i32
  }
  func.func @transform_7(%arg0: i32, %arg1: i32) -> (i32, i32, i32, i32) {
    %c0_i32 = arith.constant 0 : i32
    %c0_i32_0 = arith.constant 0 : i32
    %c0_i32_1 = arith.constant 0 : i32
    return %arg0, %arg1, %c0_i32, %c0_i32_0 : i32, i32, i32, i32
  }
}

</mosaic_0001>

<bundles_post_ra>
// kernel: tpu_custom_call.1
= control target key start
LH: loop header
LB: loop body
LE: loop exit
PB: predicated region body
PF: predicated region fallthrough
CT: control target
= control target key end

     0   :  { %s1929_s0 = inlined_call_operand.vmem [shape: bf16[2,2,16,256], index: 0, kind: input, shape index: {}]   ;;  %s1930_s1 = inlined_call_operand.hbm [shape: bf16[3,3,8,16], index: 1, kind: input, shape index: {}]   ;;  %s1931_s2 = inlined_call_operand.vmem [shape: f32[8,1], index: 2, kind: input, shape index: {}]   ;;  %s1932_s3 = inlined_call_operand.vmem [shape: bf16[32,8], index: 3, kind: input, shape index: {}]   ;;  %s1933_s4 = inlined_call_operand.vmem [shape: f32[32,1], index: 4, kind: input, shape index: {}]   ;;  %s1934_s5 = inlined_call_operand.vmem [shape: bf16[4,8], index: 5, kind: input, shape index: {}]   ;;  %s1935_s6 = inlined_call_operand.<no memory space> [shape: f32[1,1], index: 6, kind: input, shape index: {}]   ;;  %s1936_s7 = inlined_call_operand.hbm [shape: f32[2,2,16,256], index: 7, kind: output, shape index: {}]  }
   0x1   :  { %v12_v0 = vstv %s1935_s6 }
   0x2   :  { %13 = vst [vmem:[#allocation2] sm:$0x1] %v12_v0 }
   0x3   :  { %14 = vsyncpa [#allocation4], 0 }
   0x4   :  { %15 = vsyncpa [#allocation5], 0 }
   0x5   :  { %17 = vsyncpa [#allocation5 + $0x1], 0  ;;  %s1675_s26 = smov 0   ;;  %s1677_s27 = smov 0  }
   0x6   :  { %s1679_s28 = smov 0   ;;  %s1681_s29 = smov 0  }
   0x7   :  { %s1683_s30 = smov 0   ;;  %s1685_s8 = smov 0  }
   0x8   :  { %s1687_s9 = smov 0   ;;  %s1689_s10 = smov 0  }
   0x9 LB: > { %s1325_s6 = sadd.s32 4294967295, %s1615_s10   ;;  %s1326_s11 = sadd.s32 4294967294, %s1615_s10   ;;  %s1615_s10 = sphi %s1689_s10, %s23_s10   ;;  %s1611_s9 = sphi %s1687_s9, %s1959_s9   ;;  %s1607_s8 = sphi %s1685_s8, %s1958_s8   ;;  %s1603_s30 = sphi %s1683_s30, %s1957_s30   ;;  %s1599_s29 = sphi %s1681_s29, %s1956_s29   ;;  %s1595_s28 = sphi %s1679_s28, %s1955_s28   ;;  %s1591_s27 = sphi %s1677_s27, %s1954_s27   ;;  %s1587_s26 = sphi %s1675_s26, %s1953_s26  }
   0xa   : > { %s32_s12 = sadd.s32 1, %s1607_s8  ;;  %s35_s13 = sadd.s32 1, %s1611_s9 }
   0xb   : > { %p33_p0 = scmp.ge.s32.totalorder %s32_s12, 2  ;;  %s198_s14 = sadd.s32 1, %s1595_s28 }
   0xc   : > { %p208_p1 = scmp.ne.s32.totalorder %s1595_s28, %s1591_s27  ;;  %p209_p2 = scmp.eq.s32.totalorder %s1325_s6, 3 }
   0xd   : > { %s1961_s12 = smov (%p33_p0, %s32_s12), 0  ;;  %s1963_s13 = smov (!%p33_p0, %s35_s13), %s1611_s9 }
   0xe   : > { %s194_s15 = ssub.s32 %s1607_s8, %s1961_s12  ;;  %p1727_p3 = por %p209_p2, %p208_p1 }
   0xf   : > { %p37_p4 = scmp.ge.s32.totalorder %s1963_s13, 2  ;;  %p214_p5 = scmp.ne.s32.totalorder %s1591_s27, %s1587_s26 }
  0x10   : > { %s1942_s16 = scalar_select %p1727_p3, 1, 0 }
  0x11   : > { %p215_p6 = scmp.eq.s32.totalorder %s1326_s11, 3  ;;  %p1327_p7 = scmp.ge.s32.totalorder %s1615_s10, 1 }
  0x12   : > { %s1965_s13 = smov (%p37_p4, %s1963_s13), 0  ;;  %p222_p9 = scmp.lt.s32.totalorder %s1615_s10, 5 }
  0x13   : > { %1943 = sst [smem:[#allocation9_spill]] %s1965_s13  ;;  %p1736_p8 = por %p215_p6, %p214_p5 }
  0x14   : > { %s193_s18 = ssub.s32 %s1611_s9, %s1965_s13  ;;  %p1743_p10 = pnand %p1327_p7, %p222_p9 }
  0x15   : > { %s1944_s17 = scalar_select %p1736_p8, 1, 0 }
  0x16   : > { %s195_s19 = sor.u32 %s194_s15, %s193_s18  ;;  %p1747_p12 = scmp.eq.s32.totalorder %s1325_s6, 0 }
  0x17   : > { %s1945_s20 = scalar_select %p1743_p10, 1, 0 }
  0x18   : > { %p196_p11 = scmp.eq.s32.totalorder %s195_s19, 0  ;;  %p1377_p13 = pneg %p1743_p10 }
  0x19   : > { %s1946_s21 = scalar_select %p1747_p12, 1, 0 }
  0x1a   : > { %s1754_s22 = scalar_select %p196_p11, %s1595_s28, %s198_s14  }
  0x1b   : > { %s1617_s23 = smov [#allocation3]   ;;  %p1758_p0 = pnand %p1747_p12, %p1377_p13 }
  0x1c   : > { %s234_s24 = sshll.u32 %s1617_s23, 4  ;;  %s1489_s6 = scalar_lea.hbm %s1930_s1, 576  ;;  %s235_s24 = int_to_ptr.vmem [resolvable:$true] %s234_s24 }
  0x1d   : > { %p1490_p1 = scmp.ne.s32.totalorder %s1930_s1, %s1489_s6  ;;  %p1491_p2 = pneg %p1758_p0 }
  0x1e   : > { %p1496_p6 = scmp.lt.u32.totalorder %s1489_s6, %s1930_s1 }
  0x1f   : > { %p1492_p4 = pnand %p1491_p2, %p1490_p1 }
  0x21   : > { %p1493_p5 = pneg %p1492_p4 }
  0x23   : > { %p1498_p7 = pnand %p1496_p6, %p1493_p5 }
  0x25   : > { %1501 = shalt.err (!%p1498_p7)
}
  0x26   : > { %s1502_s13 = scalar_lea.vmem %s235_s24, 576  ;;  %p1510_p8 = scmp.lt.s32.totalorder %s235_s24, %s235_s24 }
  0x27   : > { %p1503_p9 = scmp.ne.s32.totalorder %s235_s24, %s1502_s13  ;;  %p1511_p3 = scmp.lt.s32.totalorder %s1502_s13, %s1502_s13 }
  0x29   : > { %p1505_p11 = pnand %p1503_p9, %p1491_p2  ;;  %p1512_p12 = por %p1511_p3, %p1510_p8 }
  0x2b   : > { %p1506_p13 = pneg %p1505_p11 }
  0x2d   : > { %p1513_p10 = pnand %p1512_p12, %p1506_p13 }
  0x2f   : > { %1516 = shalt.err (!%p1513_p10)
}
  0x30   : > { %s1618_s11 = smov 64   ;;  %s1619_s15 = smov 4  }
  0x31   : > { %1380 = dma.hbm_to_vmem [thread:$0]  (!%p1758_p0), %s1930_s1, 576, %s235_s24, [#allocation4], %s1618_s11, %s1618_s11, %s1619_s15  }
  0x32   : > { %p1948_p1 = scmp.ne.s32.totalorder %s1945_s20, 0 }
  0x33   : > { %p1949_p4 = scmp.ne.s32.totalorder (!%p1948_p1), %s1946_s21, 0 }
  0x34   : > { %277 = sbr.rel (%p1948_p1) target bundleno = 950 (0x3b6), region = 48 }
  0x3b   : > { %1578 = dma.done.wait (%p1949_p4), [#allocation4], 576  }
  0x3c   : > { %1580 = vsyncadd (%p1949_p4), [#allocation4], 4294966720  ;;  %p313_p3 = scmp.lt.s32.totalorder %s1603_s30, 1  ;;  %p315_p8 = scmp.lt.s32.totalorder %s1599_s29, 1  ;;  %v1620_v1 = vmov 0   ;;  %v825_v2 = vld [vmem:[%s1931_s2] sm:$0xff]  ;;  %v385_v59 = vlaneseq }
  0x3d   : > { %372 = vmatprep.mubr.bf16.mxu0 %v1620_v1  ;;  %429 = vmatprep.mubr.bf16.mxu1 %v1620_v1  ;;  %vm336_vm0 = vcmask 130048   ;;  %v325_v5 = vld [vmem:[#allocation3] sm:$0xf]  ;;  %v393_v6 = vld [vmem:[#allocation3 + $0x4] sm:$0xf]  ;;  %s1621_s19 = smov 18  }
  0x3e   : > { %s314_s13 = scalar_select %p313_p3, %s1603_s30, 1  ;;  %1466 = vset.pattern.permute.xlu0 %v1620_v1  ;;  %1467 = vset.pattern.permute.xlu1 %v1620_v1  ;;  %v448_v7 = vld [vmem:[#allocation3 + $0x8] sm:$0xf]  ;;  %v503_v8 = vld [vmem:[#allocation3 + $0xc] sm:$0xf]  ;;  %v841_v49 = vld [vmem:[%s1933_s4] sm:$0xff] }
  0x3f   : > { %s316_s20 = scalar_select %p315_p8, %s1599_s29, 1  ;;  %828 = vperm.xlu0 %1466, %v825_v2   ;;  %v558_v9 = vld [vmem:[#allocation3 + $0x10] sm:$0xf]  ;;  %v606_v10 = vld [vmem:[#allocation3 + $0x14] sm:$0xf]  ;;  %v842_v53 = vld [vmem:[%s1933_s4 + $0x8] sm:$0xff] }
  0x40   : > { %s1334_s24 = sshll.u32 %s314_s13, 3  ;;  %v661_v11 = vld [vmem:[#allocation3 + $0x18] sm:$0xf]  ;;  %v716_v12 = vld [vmem:[#allocation3 + $0x1c] sm:$0xf]  ;;  %s1622_s13 = smov 19  }
  0x41   : > { %s1333_s21 = sshll.u32 %s316_s20, 2  ;;  %v771_v13 = vld [vmem:[#allocation3 + $0x20] sm:$0xf]  ;;  %s1623_s20 = smov 17   ;;  %v843_v51 = vld [vmem:[%s1933_s4 + $0x10] sm:$0xff]  ;;  %v844_v54 = vld [vmem:[%s1933_s4 + $0x18] sm:$0xff] }
  0x42   : > { %s319_s25 = sadd.s32 %s1334_s24, %s1333_s21  ;;  %s1624_s24 = smov 1   ;;  %v1360_v52 = vld [vmem:[#allocation2] ss:$0 sm:$0xff]  ;;  %v386_v62 = vand.u32 127, %v385_v59  ;;  %vm882_vm9 = vcmask 1043456   ;;  %vm875_vm10 = vcmask 64512  }
  0x43   : > { %s1335_s6 = sshll.u32 %s319_s25, 2  ;;  %s1625_s21 = smov 127  }
  0x44   : > { %s321_s18 = scalar_lea.vmem %s1929_s0, %s1335_s6  ;;  %s1626_s25 = smov 110   ;;  %vm442_vm1 = vcmp.lt.s32.totalorder %v386_v62, 18  ;;  %vm387_vm2 = vcmp.lt.s32.totalorder %v386_v62, 19  ;;  %vm497_vm3 = vcmp.lt.s32.totalorder %v386_v62, 17  ;;  %vm552_vm4 = vcmp.lt.s32.totalorder %v386_v62, 1 }
  0x45   : > { %v1468_v3 = vld [vmem:[%s321_s18 + $0x4] ss:$8 sps:$4 sm:$0xff]   ;;  %v1470_v4 = vld [vmem:[%s321_s18] ss:$8 sps:$4 sm:$0xff]   ;;  %s1627_s6 = smov 111   ;;  %s1628_s14 = smov 109  }
  0x46   : > { %340 = vmatprep.subr.bf16.mxu0 %v1468_v3  ;;  %397 = vmatprep.subr.bf16.mxu1 %v1468_v3  ;;  %vm655_vm5 = vcmp.lt.s32.totalorder %v386_v62, 127  ;;  %vm710_vm6 = vcmp.lt.s32.totalorder %v386_v62, 111  ;;  %vm765_vm7 = vcmp.lt.s32.totalorder %v386_v62, 110  ;;  %vm820_vm8 = vcmp.lt.s32.totalorder %v386_v62, 109  ;;  %s310_s15 = sand.u32 1, %s1591_s27   ;;  %p1950_p12 = scmp.ne.s32.totalorder %s1942_s16, 0 }
  0x47   : > { %341 = vmatpush1.bf16.msra.mxu0 %v1470_v4  ;;  %398 = vmatpush1.bf16.msra.mxu1 %v1470_v4  ;;  %s1332_s18 = sshll.u32 %s310_s15, 5  ;;  %s1629_s11 = smov [#allocation6]  }
  0x48   : > { %452 = vmatprep.subr.bf16.mxu0 %v1468_v3  ;;  %507 = vmatprep.subr.bf16.mxu1 %v1468_v3 }
  0x4a   : > { %1338 = vmatmul.mubr.msk.bf16.vlgmr.msra.gmra.mrb[0].mxu0 %vm336_vm0, %v325_v5  ;;  %1339 = vmatmul.mubr.msk.bf16.vlgmr.msra.gmra.mrb[0].mxu1 %vm336_vm0, %v393_v6 }
  0x4b   : > { %453 = vmatpush1.bf16.msra.mxu0 %v1470_v4  ;;  %508 = vmatpush1.bf16.msra.mxu1 %v1470_v4 }
  0x4c   : > { %484 = vmatprep.mubr.bf16.mxu0 %v1620_v1  ;;  %539 = vmatprep.mubr.bf16.mxu1 %v1620_v1 }
  0x4d   : > { %562 = vmatprep.subr.bf16.mxu0 %v1468_v3  ;;  %610 = vmatprep.subr.bf16.mxu1 %v1468_v3 }
  0x52   : > { %1340 = vmatmul.mubr.msk.bf16.vlgmr.msra.gmra.mrb[4].mxu0 %vm336_vm0, %v448_v7  ;;  %1341 = vmatmul.mubr.msk.bf16.vlgmr.msra.gmra.mrb[4].mxu1 %vm336_vm0, %v503_v8 }
  0x53   : > { %563 = vmatpush1.bf16.msra.mxu0 %v1470_v4  ;;  %611 = vmatpush1.bf16.msra.mxu1 %v1470_v4 }
  0x54   : > { %594 = vmatprep.mubr.bf16.mxu0 %v1620_v1  ;;  %642 = vmatprep.mubr.bf16.mxu1 %v1620_v1 }
  0x55   : > { %665 = vmatprep.subr.bf16.mxu0 %v1468_v3  ;;  %720 = vmatprep.subr.bf16.mxu1 %v1468_v3 }
  0x5a   : > { %1342 = vmatmul.mubr.msk.bf16.vlgmr.msra.gmra.mrb[8].mxu0 %vm336_vm0, %v558_v9  ;;  %1343 = vmatmul.mubr.msk.bf16.vlgmr.msra.gmra.mrb[8].mxu1 %vm336_vm0, %v606_v10 }
  0x5b   : > { %666 = vmatpush1.bf16.msra.mxu0 %v1470_v4  ;;  %721 = vmatpush1.bf16.msra.mxu1 %v1470_v4 }
  0x5c   : > { %697 = vmatprep.mubr.bf16.mxu0 %v1620_v1  ;;  %752 = vmatprep.mubr.bf16.mxu1 %v1620_v1 }
  0x5d   : > { %775 = vmatprep.subr.bf16.mxu0 %v1468_v3 }
  0x62   : > { %1344 = vmatmul.mubr.msk.bf16.vlgmr.msra.gmra.mrb[12].mxu0 %vm336_vm0, %v661_v11  ;;  %1345 = vmatmul.mubr.msk.bf16.vlgmr.msra.gmra.mrb[12].mxu1 %vm336_vm0, %v716_v12 }
  0x63   : > { %776 = vmatpush1.bf16.msra.mxu0 %v1470_v4  ;;  %807 = vmatprep.mubr.bf16.mxu0 %v1620_v1 }
  0x64   : > { %921 = vmatprep.mubr.bf16.mxu1 %v1620_v1 }
  0x6a   : > { %1346 = vmatmul.mubr.msk.bf16.vlgmr.msra.gmra.mrb[16].mxu0 %vm336_vm0, %v771_v13 }
  0x6b   : > { %996 = vmatprep.mubr.bf16.mxu0 %v1620_v1 }
  0xbe   : > { %v829_v55 = vpop.permute.xlu0 %828 }
 0x11d   : > { %v374_v14 = vpop.f32.mrb[0].mxu0  ;;  %v431_v15 = vpop.f32.mrb[0].mxu1 }
 0x11e   : > { %438 = vrot.lane.b32.xlu1 %v431_v15, %s1621_s19  ;;  %v433_v16 = vpop.f32.mrb[1].mxu1  ;;  %381 = vrot.lane.b32.xlu0 %v374_v14, %s1622_s13  ;;  %v376_v17 = vpop.f32.mrb[1].mxu0 }
 0x11f   : > { %v378_v18 = vpop.f32.mrb[2].mxu0  ;;  %v435_v19 = vpop.f32.mrb[2].mxu1 }
 0x120   : > { %v379_v20 = vpop.f32.mrb[3].mxu0  ;;  %v436_v21 = vpop.f32.mrb[3].mxu1 }
 0x122   : > { %440 = vrot.lane.b32.xlu1 %v433_v16, %s1621_s19  ;;  %383 = vrot.lane.b32.xlu0 %v376_v17, %s1622_s13  ;;  %s1366_s19 = sshll.u32 %s1599_s29, 2  ;;  %s1367_s13 = sshll.u32 %s1603_s30, 3 }
 0x123   : > { %s1877_s29 = scalar_lea.sflag [#allocation5], %s310_s15 }
 0x125   : > { %v486_v22 = vpop.f32.mrb[4].mxu0  ;;  %v541_v23 = vpop.f32.mrb[4].mxu1 }
 0x126   : > { %v543_v24 = vpop.f32.mrb[5].mxu1  ;;  %493 = vrot.lane.b32.xlu0 %v486_v22, %s1623_s20  ;;  %v488_v25 = vpop.f32.mrb[5].mxu0 }
 0x127   : > { %v545_v26 = vpop.f32.mrb[6].mxu1  ;;  %495 = vrot.lane.b32.xlu1 %v488_v25, %s1623_s20  ;;  %v490_v27 = vpop.f32.mrb[6].mxu0  ;;  %s312_s20 = scalar_lea.vmem [#allocation6], %s1332_s18  ;;  %s1521_s18 = sshll.u32 %s1629_s11, 4  ;;  %s1522_s18 = int_to_ptr.vmem [resolvable:$false] %s1521_s18 }
 0x128   : > { %v491_v28 = vpop.f32.mrb[7].mxu0  ;;  %v546_v29 = vpop.f32.mrb[7].mxu1 }
 0x12a   : > { %548 = vrot.lane.b32.xlu0 %v541_v23, %s1624_s24 }
 0x12b   : > { %550 = vrot.lane.b32.xlu1 %v543_v24, %s1624_s24  ;;  %s1225_s24 = sadd.s32 %s1367_s13, %s1366_s19  ;;  %s1523_s19 = scalar_lea.vmem %s1522_s18, 1024 }
 0x12d   : > { %v1816_v30 = vpop.f32.mrb[8].mxu0  ;;  %v644_v31 = vpop.f32.mrb[8].mxu1 }
 0x12e   : > { %v646_v32 = vpop.f32.mrb[9].mxu1  ;;  %651 = vrot.lane.b32.xlu0 %v644_v31, %s1625_s21  ;;  %v1818_v33 = vpop.f32.mrb[9].mxu0 }
 0x12f   : > { %v648_v34 = vpop.f32.mrb[10].mxu1  ;;  %653 = vrot.lane.b32.xlu1 %v646_v32, %s1625_s21  ;;  %v600_v35 = vpop.f32.mrb[10].mxu0  ;;  %s1368_s21 = sshll.u32 %s1225_s24, 7 }
 0x130   : > { %v601_v36 = vpop.f32.mrb[11].mxu0  ;;  %v649_v37 = vpop.f32.mrb[11].mxu1  ;;  %s1873_s23 = scalar_lea.hbm %s1936_s7, %s1368_s21 }
 0x135   : > { %v699_v38 = vpop.f32.mrb[12].mxu0  ;;  %v754_v39 = vpop.f32.mrb[12].mxu1 }
 0x136   : > { %v756_v40 = vpop.f32.mrb[13].mxu1  ;;  %761 = vrot.lane.b32.xlu1 %v754_v39, %s1626_s25  ;;  %v701_v41 = vpop.f32.mrb[13].mxu0  ;;  %706 = vrot.lane.b32.xlu0 %v699_v38, %s1627_s6 }
 0x137   : > { %v703_v42 = vpop.f32.mrb[14].mxu0  ;;  %v758_v43 = vpop.f32.mrb[14].mxu1 }
 0x138   : > { %v704_v44 = vpop.f32.mrb[15].mxu0  ;;  %v759_v45 = vpop.f32.mrb[15].mxu1 }
 0x13a   : > { %708 = vrot.lane.b32.xlu1 %v701_v41, %s1627_s6 }
 0x13d   : > { %v809_v46 = vpop.f32.mrb[16].mxu0 }
 0x13e   : > { %763 = vrot.lane.b32.xlu1 %v756_v40, %s1626_s25  ;;  %816 = vrot.lane.b32.xlu0 %v809_v46, %s1628_s14  ;;  %v811_v47 = vpop.f32.mrb[17].mxu0  ;;  %s1228_s25 = sshll.u32 %s312_s20, 4  ;;  %s1875_s25 = int_to_ptr.vmem [resolvable:$true] %s1228_s25 }
 0x13f   : > { %v813_v48 = vpop.f32.mrb[18].mxu0  ;;  %s1517_s30 = scalar_lea.vmem %s1875_s25, 512  ;;  %p1524_p5 = scmp.lt.s32.totalorder %s1875_s25, %s1522_s18 }
 0x140   : > { %v814_v50 = vpop.f32.mrb[19].mxu0  ;;  %p1518_p10 = scmp.ne.s32.totalorder %s1875_s25, %s1517_s30  ;;  %p1525_p6 = scmp.lt.s32.totalorder %s1523_s19, %s1517_s30 }
 0x141   : > { %v1471_v50 = vld [vmem:[%s1932_s3] sm:$0xff]  }
 0x142   : > { %847 = vperm.xlu0 %1466, %v841_v49   ;;  %818 = vrot.lane.b32.xlu1 %v811_v47, %s1628_s14  ;;  %p1519_p0 = pnand %p1518_p10, %p1950_p12  ;;  %p1526_p7 = por %p1525_p6, %p1524_p5 }
 0x144   : > { %p1520_p2 = pneg %p1519_p0 }
 0x146   : > { %857 = vperm.xlu0 %1466, %v843_v51   ;;  %852 = vperm.xlu1 %1467, %v842_v53   ;;  %v1472_v51 = vld [vmem:[%s1932_s3 + $0x8] sm:$0xff]   ;;  %p1527_p9 = pnand %p1526_p7, %p1520_p2 }
 0x14a   : > { %1177 = vperm.xlu0 %1466, %v1360_v52   ;;  %862 = vperm.xlu1 %1467, %v844_v54  }
 0x190   : > { %v439_v56 = vpop.permute.xlu1 %438  ;;  %v382_v57 = vpop.permute.xlu0 %381 }
 0x194   : > { %v441_v58 = vpop.permute.xlu1 %440  ;;  %v384_v60 = vpop.permute.xlu0 %383 }
 0x195   : > { %v443_v2 = vsel %vm442_vm1, %v439_v56, %v441_v58  ;;  %v444_v3 = vsel %vm442_vm1, %v441_v58, %v439_v56  ;;  %v388_v4 = vsel %vm387_vm2, %v382_v57, %v384_v60  ;;  %v389_v5 = vsel %vm387_vm2, %v384_v60, %v382_v57 }
 0x196   : > { %v445_v9 = vadd.f32 %v444_v3, %v389_v5  ;;  %v446_v10 = vadd.f32 %v443_v2, %v388_v4 }
 0x198   : > { %v494_v63 = vpop.permute.xlu0 %493 }
 0x199   : > { %v496_v61 = vpop.permute.xlu1 %495 }
 0x19a   : > { %v498_v7 = vsel %vm497_vm3, %v494_v63, %v496_v61  ;;  %v499_v8 = vsel %vm497_vm3, %v496_v61, %v494_v63 }
 0x19b   : > { %v500_v14 = vadd.f32 %v499_v8, %v445_v9  ;;  %v501_v15 = vadd.f32 %v498_v7, %v446_v10 }
 0x19c   : > { %v549_v6 = vpop.permute.xlu0 %548 }
 0x19d   : > { %v551_v0 = vpop.permute.xlu1 %550 }
 0x19e   : > { %v553_v12 = vsel %vm552_vm4, %v549_v6, %v551_v0  ;;  %v554_v13 = vsel %vm552_vm4, %v551_v0, %v549_v6 }
 0x19f   : > { %v555_v16 = vadd.f32 %v554_v13, %v500_v14  ;;  %v556_v17 = vadd.f32 %v553_v12, %v501_v15 }
 0x1a0   : > { %v652_v18 = vpop.permute.xlu0 %651 }
 0x1a1   : > { %v654_v11 = vpop.permute.xlu1 %653  ;;  %v603_v20 = vadd.f32 %v1816_v30, %v555_v16  ;;  %v604_v21 = vadd.f32 %v1818_v33, %v556_v17  ;;  %v954_v17 = vld [vmem:[%s1934_s5] sm:$0x3] }
 0x1a2   : > { %v656_v24 = vsel %vm655_vm5, %v652_v18, %v654_v11  ;;  %v657_v25 = vsel %vm655_vm5, %v654_v11, %v652_v18 }
 0x1a3   : > { %v658_v28 = vadd.f32 %v656_v24, %v603_v20  ;;  %v659_v29 = vadd.f32 %v657_v25, %v604_v21 }
 0x1a8   : > { %v762_v19 = vpop.permute.xlu1 %761  ;;  %v707_v22 = vpop.permute.xlu0 %706 }
 0x1ac   : > { %v709_v23 = vpop.permute.xlu1 %708 }
 0x1ad   : > { %v711_v26 = vsel %vm710_vm6, %v707_v22, %v709_v23  ;;  %v712_v27 = vsel %vm710_vm6, %v709_v23, %v707_v22 }
 0x1ae   : > { %v713_v35 = vadd.f32 %v711_v26, %v658_v28  ;;  %v714_v36 = vadd.f32 %v712_v27, %v659_v29 }
 0x1b0   : > { %v764_v31 = vpop.permute.xlu1 %763  ;;  %v817_v37 = vpop.permute.xlu0 %816 }
 0x1b1   : > { %v766_v32 = vsel %vm765_vm7, %v762_v19, %v764_v31  ;;  %v767_v34 = vsel %vm765_vm7, %v764_v31, %v762_v19 }
 0x1b2   : > { %v768_v30 = vadd.f32 %v766_v32, %v713_v35  ;;  %v769_v38 = vadd.f32 %v767_v34, %v714_v36 }
 0x1b4   : > { %v819_v33 = vpop.permute.xlu1 %818 }
 0x1b5   : > { %v821_v39 = vsel %vm820_vm8, %v817_v37, %v819_v33  ;;  %v822_v40 = vsel %vm820_vm8, %v819_v33, %v817_v37 }
 0x1b6   : > { %v823_v41 = vadd.f32 %v821_v39, %v768_v30  ;;  %v824_v42 = vadd.f32 %v822_v40, %v769_v38 }
 0x1b8   : > { %v831_v43 = vadd.f32 %v829_v55, %v823_v41  ;;  %v832_v44 = vadd.f32 %v829_v55, %v824_v42 }
 0x1ba   : > { %v833_v45 = vmax.f32 %v831_v43, 0.0  ;;  %v834_v46 = vmax.f32 %v832_v44, 0.0 }
 0x1bc   : > { %v836_v47 = vpack.c.bf16 %v834_v46, %v834_v46  ;;  %v835_v48 = vpack.c.bf16 %v833_v45, %v833_v45 }
 0x1be   : > { %1349 = vmatprep.subr.msk.bf16.mxu1 %vm882_vm9, %v836_v47  ;;  %v884_v49 = vsel %vm882_vm9, %v835_v48, 0 }
 0x1bf   : > { %890 = vmatpush1.bf16.msra.mxu1 %v884_v49 }
 0x1c1   : > { %v848_v52 = vpop.permute.xlu0 %847 }
 0x1c2   : > { %1350 = vmatmul.mubr.msk.bf16.vlgmr.msra.gmra.mrb[16].mxu1 %vm875_vm10, %v1471_v50 }
 0x1c3   : > { %931 = vmatprep.mubr.bf16.mxu1 %v1620_v1 }
 0x1c5   : > { %v853_v56 = vpop.permute.xlu1 %852  ;;  %v858_v4 = vpop.permute.xlu0 %857 }
 0x1c9   : > { %v863_v12 = vpop.permute.xlu1 %862  ;;  %v1178_v36 = vpop.permute.xlu0 %1177 }
 0x1ca   : > { %1351 = vmatmul.mubr.msk.bf16.gmra.mrb[20].mxu1 %vm875_vm10, %v1472_v51 }
 0x1cb   : > { %1094 = vmatprep.mubr.bf16.mxu1 %v1620_v1 }
 0x295   : > { %v923_v53 = vpop.f32.mrb[16].mxu1 }
 0x296   : > { %v924_v54 = vadd.f32 %v923_v53, %v848_v52  ;;  %v925_v55 = vpop.f32.mrb[17].mxu1 }
 0x297   : > { %v926_v57 = vadd.f32 %v925_v55, %v848_v52  ;;  %v927_v58 = vpop.f32.mrb[18].mxu1 }
 0x298   : > { %v928_v59 = vadd.f32 %v927_v58, %v853_v56  ;;  %v929_v60 = vpop.f32.mrb[19].mxu1  ;;  %v942_v62 = vmax.f32 %v924_v54, 0.0 }
 0x299   : > { %v930_v61 = vadd.f32 %v929_v60, %v853_v56  ;;  %v943_v0 = vmax.f32 %v926_v57, 0.0 }
 0x29a   : > { %v944_v63 = vmax.f32 %v928_v59, 0.0 }
 0x29b   : > { %v945_v2 = vmax.f32 %v930_v61, 0.0 }
 0x29c   : > { %v950_v3 = vpack.c.bf16 %v944_v63, %v942_v62 }
 0x29d   : > { %v951_v5 = vpack.c.bf16 %v945_v2, %v943_v0  ;;  %v933_v6 = vpop.f32.mrb[20].mxu1 }
 0x29e   : > { %v934_v7 = vadd.f32 %v933_v6, %v858_v4  ;;  %v935_v8 = vpop.f32.mrb[21].mxu1  ;;  %v959_v9 = vsel %vm882_vm9, %v950_v3, 0  ;;  %v1007_v10 = vrot.slane %v950_v3, 4 }
 0x29f   : > { %v1008_v11 = vrot.slane %v951_v5, 4  ;;  %v936_v13 = vadd.f32 %v935_v8, %v858_v4  ;;  %v937_v14 = vpop.f32.mrb[22].mxu1  ;;  %1352 = vmatprep.subr.msk.bf16.mxu0 %vm882_vm9, %v951_v5 }
 0x2a0   : > { %v938_v15 = vadd.f32 %v937_v14, %v863_v12  ;;  %v939_v16 = vpop.f32.mrb[23].mxu1  ;;  %965 = vmatpush1.bf16.msra.mxu0 %v959_v9  ;;  %v946_v19 = vmax.f32 %v934_v7, 0.0  ;;  %v1010_v23 = vsel %vm882_vm9, %v1007_v10, 0 }
 0x2a1   : > { %v940_v18 = vadd.f32 %v939_v16, %v863_v12  ;;  %1354 = vmatprep.subr.msk.bf16.mxu0 %vm882_vm9, %v1008_v11  ;;  %v947_v21 = vmax.f32 %v936_v13, 0.0 }
 0x2a2   : > { %v948_v20 = vmax.f32 %v938_v15, 0.0 }
 0x2a3   : > { %v949_v22 = vmax.f32 %v940_v18, 0.0  ;;  %1353 = vmatmul.mubr.msk.bf16.vlgmr.msra.gmra.mrb[20].mxu0 %vm875_vm10, %v954_v17 }
 0x2a4   : > { %v952_v24 = vpack.c.bf16 %v948_v20, %v946_v19  ;;  %1016 = vmatpush1.bf16.msra.mxu0 %v1010_v23  ;;  %1047 = vmatprep.mubr.bf16.mxu0 %v1620_v1 }
 0x2a5   : > { %v953_v25 = vpack.c.bf16 %v949_v22, %v947_v21 }
 0x2a6   : > { %v1057_v26 = vsel %vm882_vm9, %v952_v24, 0  ;;  %v1105_v27 = vrot.slane %v952_v24, 4 }
 0x2a7   : > { %v1106_v28 = vrot.slane %v953_v25, 4  ;;  %1356 = vmatprep.subr.msk.bf16.mxu1 %vm882_vm9, %v953_v25 }
 0x2a8   : > { %1063 = vmatpush1.bf16.msra.mxu1 %v1057_v26  ;;  %v1108_v29 = vsel %vm882_vm9, %v1105_v27, 0 }
 0x2a9   : > { %1358 = vmatprep.subr.msk.bf16.mxu0 %vm882_vm9, %v1106_v28 }
 0x2ab   : > { %1355 = vmatmul.mubr.msk.bf16.vlgmr.msra.gmra.mrb[24].mxu0 %vm875_vm10, %v954_v17  ;;  %1357 = vmatmul.mubr.msk.bf16.vlgmr.msra.gmra.mrb[24].mxu1 %vm875_vm10, %v954_v17 }
 0x2ac   : > { %1114 = vmatpush1.bf16.msra.mxu0 %v1108_v29  ;;  %1145 = vmatprep.mubr.bf16.mxu0 %v1620_v1 }
 0x2b3   : > { %1359 = vmatmul.mubr.msk.bf16.vlgmr.msra.gmra.mrb[28].mxu0 %vm875_vm10, %v954_v17 }
 0x376   : > { %v998_v31 = vpop.f32.mrb[20].mxu0 }
 0x377   : > { %v1000_v32 = vpop.f32.mrb[21].mxu0 }
 0x378   : > { %v1002_v34 = vpop.f32.mrb[22].mxu0 }
 0x379   : > { %v1003_v35 = vpop.f32.mrb[23].mxu0 }
 0x37e   : > { %v1049_v37 = vpop.f32.mrb[24].mxu0  ;;  %v1096_v30 = vpop.f32.mrb[24].mxu1 }
 0x37f   : > { %v1156_v38 = vrot.slane %v1049_v37, 4  ;;  %v1051_v33 = vpop.f32.mrb[25].mxu0  ;;  %v1098_v39 = vpop.f32.mrb[25].mxu1 }
 0x380   : > { %v1157_v40 = vrot.slane %v1051_v33, 4  ;;  %v1053_v41 = vpop.f32.mrb[26].mxu0  ;;  %v1100_v42 = vpop.f32.mrb[26].mxu1 }
 0x381   : > { %v1166_v43 = vsel %vm882_vm9, %v998_v31, %v1156_v38  ;;  %v1054_v44 = vpop.f32.mrb[27].mxu0  ;;  %v1101_v45 = vpop.f32.mrb[27].mxu1 }
 0x382   : > { %v1180_v1 = vadd.f32 %v1178_v36, %v1166_v43  ;;  %v1167_v46 = vsel %vm882_vm9, %v1000_v32, %v1157_v40 }
 0x383   : > { %v1181_v47 = vadd.f32 %v1178_v36, %v1167_v46 }
 0x384   : > { %v1361_v48 = vmul.f32 -1.442695, %v1180_v1 }
 0x385   : > { %v1362_v49 = vmul.f32 -1.442695, %v1181_v47 }
 0x386   : > { %1473 = vpow2.f32 %v1361_v48  ;;  %v1147_v50 = vpop.f32.mrb[28].mxu0 }
 0x387   : > { %1475 = vpow2.f32 %v1362_v49  ;;  %v1162_v51 = vrot.slane %v1147_v50, 4  ;;  %v1149_v52 = vpop.f32.mrb[29].mxu0 }
 0x388   : > { %v1163_v53 = vrot.slane %v1149_v52, 4  ;;  %v1151_v54 = vpop.f32.mrb[30].mxu0 }
 0x389   : > { %v1168_v55 = vsel %vm882_vm9, %v1096_v30, %v1162_v51  ;;  %v1152_v56 = vpop.f32.mrb[31].mxu0 }
 0x38a   : > { %v1182_v57 = vadd.f32 %v1178_v36, %v1168_v55  ;;  %v1169_v58 = vsel %vm882_vm9, %v1098_v39, %v1163_v53 }
 0x38b   : > { %v1183_v59 = vadd.f32 %v1178_v36, %v1169_v58 }
 0x38c   : > { %v1363_v60 = vmul.f32 -1.442695, %v1182_v57 }
 0x38d   : > { %v1364_v61 = vmul.f32 -1.442695, %v1183_v59 }
 0x38e   : > { %1477 = vpow2.f32 %v1363_v60 }
 0x38f   : > { %1479 = vpow2.f32 %v1364_v61 }
 0x390   : > { %v1474_v62 = vpop.eup %1473 }
 0x391   : > { %v1476_v63 = vpop.eup %1475  ;;  %v1196_v0 = vadd.f32 1.0, %v1474_v62 }
 0x392   : > { %v1197_v2 = vadd.f32 1.0, %v1476_v63 }
 0x393   : > { %1481 = vrcp.f32 %v1196_v0 }
 0x394   : > { %1483 = vrcp.f32 %v1197_v2 }
 0x398   : > { %v1478_v3 = vpop.eup %1477 }
 0x399   : > { %v1480_v4 = vpop.eup %1479  ;;  %v1198_v5 = vadd.f32 1.0, %v1478_v3 }
 0x39a   : > { %v1199_v6 = vadd.f32 1.0, %v1480_v4 }
 0x39b   : > { %1485 = vrcp.f32 %v1198_v5 }
 0x39c   : > { %1487 = vrcp.f32 %v1199_v6 }
 0x39d   : > { %v1482_v7 = vpop.eup %1481 }
 0x39e   : > { %v1484_v8 = vpop.eup %1483  ;;  %1208 = vst [vmem:[%s312_s20] sm:$0xff] %v1482_v7 }
 0x39f   : > { %1209 = vst [vmem:[%s312_s20 + $0x8] sm:$0xff] %v1484_v8 }
 0x3a5   : > { %v1486_v9 = vpop.eup %1485 }
 0x3a6   : > { %v1488_v10 = vpop.eup %1487  ;;  %1210 = vst [vmem:[%s312_s20 + $0x10] sm:$0xff] %v1486_v9 }
 0x3a7   : > { %1211 = vst [vmem:[%s312_s20 + $0x18] sm:$0xff] %v1488_v10 }
 0x3a8   : > { %1530 = shalt.err (!%p1527_p9)
}
 0x3a9   : > { %s1531_s15 = scalar_lea.hbm %s1873_s23, 512  ;;  %s1535_s24 = scalar_lea.hbm %s1936_s7, 2048 }
 0x3aa   : > { %p1532_p11 = scmp.ne.s32.totalorder %s1873_s23, %s1531_s15  ;;  %p1536_p4 = scmp.lt.u32.totalorder %s1873_s23, %s1936_s7 }
 0x3ab   : > { %p1537_p3 = scmp.lt.u32.totalorder %s1535_s24, %s1531_s15  ;;  %p1539_p10 = scmp.lt.u32.totalorder %s1531_s15, %s1873_s23 }
 0x3ac   : > { %p1533_p13 = pnand %p1532_p11, %p1950_p12 }
 0x3ad   : > { %p1538_p8 = por %p1537_p3, %p1536_p4 }
 0x3ae   : > { %p1534_p1 = pneg %p1533_p13 }
 0x3af   : > { %p1540_p0 = por %p1539_p10, %p1538_p8 }
 0x3b1   : > { %p1541_p2 = pnand %p1540_p0, %p1534_p1 }
 0x3b3   : > { %1544 = shalt.err (!%p1541_p2)
}
 0x3b4   : > { %s1630_s14 = smov 256   ;;  %s1631_s30 = smov 16  }
 0x3b5   : > { %1375 = dma.vmem_to_hbm [thread:$0]  (%p1950_p12), %s1875_s25, 512, %s1873_s23, %s1877_s29, %s1630_s14, %s1630_s14, %s1631_s30  }
 0x3b6 PF: > { %p1387_p5 = scmp.ge.s32.totalorder %s1615_s10, 2  ;;  %s1243_s11 = sand.u32 1, %s1587_s26  }
 0x3b7   : > { %p1951_p6 = scmp.ne.s32.totalorder %s1944_s17, 0  ;;  %s1244_s18 = scalar_lea.sflag [#allocation5], %s1243_s11 }
 0x3b9   : > { %p1382_p7 = pnand %p1387_p5, %p1951_p6 }
 0x3bb   : > { %1582 = dma.done.wait (!%p1382_p7), %s1244_s18, 512  }
 0x3bc   : > { %1584 = vsyncadd (!%p1382_p7), %s1244_s18, 4294966784  ;;  %s23_s10 = sadd.s32 1, %s1615_s10   ;;  %s1952_s16 = sld [smem:[#allocation9_spill]] }
 0x3bd   : > { %p20_p9 = scmp.ge.s32.totalorder %s23_s10, 6   ;;  %s1953_s26 = smov %s1591_s27 }
 0x3be   : > { %s1954_s27 = smov %s1595_s28  ;;  %s1955_s28 = smov %s1754_s22 }
 0x3bf   : > { %s1956_s29 = smov %s1607_s8  ;;  %s1957_s30 = smov %s1611_s9 }
 0x3c0   : > { %s1958_s8 = smov %s1961_s12  ;;  %22 = sbr.rel (!%p20_p9) target bundleno = 9 (0x9), region = 96 }
 0x3c2   : > { %s1959_s9 = smov %s1952_s16 }
 0x3c7   :  { %1249 = vsyncpa [#allocation4], 1 }
 0x3c8   :  { %1251 = vsyncpa [#allocation4 + $0x1], 1 }
 0x3c9   :  { %1252 = vsyncpa [#allocation5], 1 }
 0x3ca   :  { %1254 = vsyncpa [#allocation5 + $0x1], 1 }

</bundles_post_ra>
